<compile_context>
chip_gen: v6e
topology: v6e:2x2x1
jax: 0.10.0
libtpu: 0.0.40
codegen_flags: <defaults>
</compile_context>

<pallas_src>
import functools

import jax
import jax.numpy as jnp
from jax.experimental import pallas as pl
from jax.experimental.pallas import tpu as pltpu

D = 6            # embeddingDim
D_PAD = 128      # lane padding
NUM_LAYERS = 2   # args.num_layers (synthetic default)


def _pad2(x, rows, cols):
    r, c = x.shape
    return jnp.pad(x, ((0, rows - r), (0, cols - c)))


def _round_up(n, m):
    return ((n + m - 1) // m) * m


def _depth_mean_coefs(num_layers):
    # final = mean_d( mean(L_1..L_{min(d+1, L)}) )  ==  sum_k coef_k * L_k
    coefs = [0.0] * num_layers
    for depth in range(num_layers + 1):
        m = min(depth + 1, num_layers)
        for k in range(m):
            coefs[k] += 1.0 / m
    return tuple(c / (num_layers + 1) for c in coefs)


def _choose_row_tile(n_pad, max_bytes=2 * 1024 * 1024):
    # Largest multiple of 128 that divides n_pad with a bf16 A-slab <= max_bytes.
    tm = min(n_pad, 512)
    while tm > 128 and (n_pad % tm != 0 or tm * n_pad * 2 > max_bytes):
        tm -= 128
    return max(tm, 128)


def _vmem_budget_bytes(n_pad, tm):
    need = (2 * tm * n_pad * 2          # A row slab, double-buffered bf16
            + 2 * n_pad * D_PAD * 2     # X0 block (bf16)
            + 2 * D_PAD * D_PAD * 4     # per-layer W block (f32)
            + 2 * D_PAD * 4             # per-layer b block
            + 2 * tm * D_PAD * 4        # output block (f32)
            + 2 * n_pad * D_PAD * 2     # ping-pong X scratch (bf16)
            + n_pad * D_PAD * 4)        # f32 accumulator scratch
    # 2x headroom, clamped so the request also fits v7x physical VMEM (64 MiB).
    return int(min(max(need * 2, 16 * 1024 * 1024), 48 * 1024 * 1024))


# --------------------------- fused propagation kernel ------------------------

def _propagation_kernel(a_ref, x0_ref, w_ref, b_ref, o_ref, x_buf, acc_ref,
                        *, tm, n_pad, coefs):
    """grid = (num_layers, num_row_tiles); layer axis outer (sequential)."""
    l = pl.program_id(0)
    r = pl.program_id(1)

    # Seed the ping-pong activation buffer with the input embeddings once.
    @pl.when(jnp.logical_and(l == 0, r == 0))
    def _():
        x_buf[pl.ds(0, n_pad), :] = x0_ref[...]

    slot_in = jax.lax.rem(l, 2)
    slot_out = jax.lax.rem(l + 1, 2)
    base_in = pl.multiple_of(slot_in * n_pad, 128)
    base_out = pl.multiple_of(slot_out * n_pad, 128)
    row0 = pl.multiple_of(r * tm, 128)

    # GCNConv tile: (A_slab @ X) @ W + b  — bf16 MXU operands, f32 accumulation.
    x_cur = x_buf[pl.ds(base_in, n_pad), :]                               # [n_pad, 128] bf16
    ax = jnp.dot(a_ref[...], x_cur, preferred_element_type=jnp.float32)   # [tm, 128] f32
    out = jnp.dot(ax, w_ref[0], preferred_element_type=jnp.float32) + b_ref[0]

    # Stash this layer's output rows for the next layer (other ping-pong slot).
    x_buf[pl.ds(base_out + row0, tm), :] = out.astype(x_buf.dtype)

    # Weighted depth-mean accumulation (coefficients are trace-time constants).
    coef = jnp.float32(coefs[0])
    for k in range(1, len(coefs)):
        coef = jnp.where(l == k, jnp.float32(coefs[k]), coef)

    @pl.when(l == 0)
    def _():
        acc_ref[pl.ds(row0, tm), :] = jnp.zeros_like(out)

    acc_new = acc_ref[pl.ds(row0, tm), :] + coef * out
    acc_ref[pl.ds(row0, tm), :] = acc_new
    # Partial sums are overwritten on revisit; the last layer's write wins.
    o_ref[...] = acc_new


def propagation(a_hat_bf16, x0_bf16, w_stack, b_stack, num_layers):
    n_pad = a_hat_bf16.shape[0]
    tm = _choose_row_tile(n_pad)
    coefs = _depth_mean_coefs(num_layers)
    kernel = functools.partial(_propagation_kernel, tm=tm, n_pad=n_pad, coefs=coefs)
    return pl.pallas_call(
        kernel,
        out_shape=jax.ShapeDtypeStruct((n_pad, D_PAD), jnp.float32),
        grid=(num_layers, n_pad // tm),
        in_specs=[
            pl.BlockSpec((tm, n_pad), lambda l, r: (r, 0)),           # A_hat row slab (bf16)
            pl.BlockSpec((n_pad, D_PAD), lambda l, r: (0, 0)),        # X0, resident (bf16)
            pl.BlockSpec((1, D_PAD, D_PAD), lambda l, r: (l, 0, 0)),  # per-layer W (f32)
            pl.BlockSpec((1, 1, D_PAD), lambda l, r: (l, 0, 0)),      # per-layer b (f32)
        ],
        out_specs=pl.BlockSpec((tm, D_PAD), lambda l, r: (r, 0)),
        scratch_shapes=[
            pltpu.VMEM((2 * n_pad, D_PAD), jnp.bfloat16),  # ping-pong activation
            pltpu.VMEM((n_pad, D_PAD), jnp.float32),       # weighted-sum accumulator
        ],
        compiler_params=pltpu.CompilerParams(
            # Layer axis has cross-iteration deps via scratch; row tiles share the
            # X scratch across tiles -> both sequential.
            dimension_semantics=("arbitrary", "arbitrary"),
            vmem_limit_bytes=_vmem_budget_bytes(n_pad, tm),
        ),
    )(a_hat_bf16, x0_bf16, w_stack, b_stack)


# --------------------------- rating kernel -----------------------------------

def _rating_kernel(ue_ref, ie_ref, up_ref, ir_ref, o_ref):
    # sigmoid(U @ I^T) via dot_general contracting dims — no in-kernel .T (XLU).
    dn = (((1,), (1,)), ((), ()))
    emb = jax.lax.dot_general(ue_ref[...], ie_ref[...], dimension_numbers=dn,
                              preferred_element_type=jnp.float32)
    pref = jax.lax.dot_general(up_ref[...], ir_ref[...], dimension_numbers=dn,
                               preferred_element_type=jnp.float32)
    o_ref[...] = jax.nn.sigmoid(emb) + 0.5 * jax.nn.sigmoid(pref)


def rating_preds(user_emb_p, item_emb_p, user_pref_p, item_rate_p):
    bu = user_emb_p.shape[0]
    bi = item_emb_p.shape[0]
    return pl.pallas_call(
        _rating_kernel,
        out_shape=jax.ShapeDtypeStruct((bu, bi), jnp.float32),
        grid=(1,),
        in_specs=[
            pl.BlockSpec((bu, D_PAD), lambda i: (0, 0)),
            pl.BlockSpec((bi, D_PAD), lambda i: (0, 0)),
            pl.BlockSpec((bu, D_PAD), lambda i: (0, 0)),
            pl.BlockSpec((bi, D_PAD), lambda i: (0, 0)),
        ],
        out_specs=pl.BlockSpec((bu, bi), lambda i: (0, 0)),
        compiler_params=pltpu.CompilerParams(dimension_semantics=("arbitrary",)),
    )(user_emb_p, item_emb_p, user_pref_p, item_rate_p)


# --------------------------- parameter setup ---------------------------------

def build_normalized_adj(edge_index, n):
    """A_hat = D^-1/2 (A + I) D^-1/2, as used by GCNConv with self-loops."""
    a = jnp.zeros((n, n), jnp.float32)
    a = a.at[edge_index[0], edge_index[1]].set(1.0)
    a = a.at[edge_index[1], edge_index[0]].set(1.0)
    a = a + jnp.eye(n, dtype=jnp.float32)
    deg = jnp.sum(a, axis=1)
    d_inv_sqrt = jnp.where(deg > 0, 1.0 / jnp.sqrt(jnp.maximum(deg, 1e-12)), 0.0)
    return a * d_inv_sqrt[:, None] * d_inv_sqrt[None, :]


def init_params(key, num_users, num_items, num_layers=NUM_LAYERS):
    keys = jax.random.split(key, 2 + num_layers)
    user_pref = jax.random.normal(keys[0], (num_users, D), jnp.float32)
    item_rate = jax.random.normal(keys[1], (num_items, D), jnp.float32)

    # GCNConv weights: glorot uniform [D, D] (stored so kernel computes X @ W),
    # bias zeros (PyG default).
    limit = (6.0 / (D + D)) ** 0.5
    gcn_w = [
        jax.random.uniform(keys[2 + l], (D, D), jnp.float32, -limit, limit)
        for l in range(num_layers)
    ]
    gcn_b = [jnp.zeros((D,), jnp.float32) for _ in range(num_layers)]

    # synthetic bipartite user<->item edges (users: 0..U-1, items: U..U+I-1)
    src, dst = [], []
    for u in range(num_users):
        for k in range(2):
            src.append(u)
            dst.append(num_users + (u + k) % num_items)
    edge_index = jnp.array([src, dst], dtype=jnp.int32)
    n = num_users + num_items
    a_hat = build_normalized_adj(edge_index, n)

    return dict(
        num_users=num_users,
        num_items=num_items,
        num_layers=num_layers,
        user_preferences=user_pref,
        item_ratings=item_rate,
        gcn_w=gcn_w,
        gcn_b=gcn_b,
        a_hat=a_hat,
    )


# --------------------------- forward (glue + kernels) ------------------------

def asfgnn_forward(params, user_ids, item_ids):
    num_users = params["num_users"]
    num_items = params["num_items"]
    num_layers = params["num_layers"]
    up_t = params["user_preferences"]   # [U, 6]
    ir_t = params["item_ratings"]       # [I, 6]

    # userPrefEmbeddings / itemRatingEmbeddings are Linear(6,6) with eye weight
    # and zero bias at init -> identity; dropped (pure dispatch overhead).
    user_pref_emb = up_t[user_ids]
    item_rate_emb = ir_t[item_ids]

    # ---------------- propagation (finalIntegration = 'MEAN') ----------------
    x0 = jnp.concatenate([up_t, ir_t], axis=0)              # [N, 6]
    n = x0.shape[0]
    n_pad = _round_up(n, 128)                                # lane-dense A_hat / full MXU K
    a_hat_p = _pad2(params["a_hat"], n_pad, n_pad).astype(jnp.bfloat16)
    x0_p = _pad2(x0, n_pad, D_PAD).astype(jnp.bfloat16)
    w_stack = jnp.stack([_pad2(w, D_PAD, D_PAD) for w in params["gcn_w"]])       # [L,128,128]
    b_stack = jnp.stack([_pad2(b[None, :], 1, D_PAD) for b in params["gcn_b"]])  # [L,1,128]

    final = propagation(a_hat_p, x0_p, w_stack, b_stack, num_layers)  # [n_pad, 128] f32

    user_final = final[:num_users]
    item_final = final[num_users:n]
    u_emb = user_final[user_ids]                             # [Bu, 128]
    i_emb = item_final[item_ids]                             # [Bi, 128]

    bu = int(user_ids.shape[0])
    bi = int(item_ids.shape[0])
    bu_pad = _round_up(bu, 8)
    bi_pad = _round_up(bi, 128)                              # lane-dense rating output

    out = rating_preds(
        _pad2(u_emb, bu_pad, D_PAD),
        _pad2(i_emb, bi_pad, D_PAD),
        _pad2(user_pref_emb, bu_pad, D_PAD),
        _pad2(item_rate_emb, bi_pad, D_PAD),
    )
    return out[:bu, :bi]                                     # ratingPreds [Bu, Bi]


# ------------------------------- main ----------------------------------------

if __name__ == "__main__":
    key = jax.random.PRNGKey(0)
    num_users, num_items = 8, 8

    params = init_params(key, num_users, num_items, num_layers=NUM_LAYERS)

    user_ids = jnp.array([0, 1, 2, 3], dtype=jnp.int32)
    item_ids = jnp.array([0, 1, 2, 3], dtype=jnp.int32)

    fwd = jax.jit(functools.partial(asfgnn_forward, params))
    ratings = fwd(user_ids, item_ids)
    jax.block_until_ready(ratings)

    assert ratings.shape == (user_ids.shape[0], item_ids.shape[0])
    assert bool(jnp.all(jnp.isfinite(ratings)))
    print("KERNEL_OK")
</pallas_src>

<mosaic_0001>
module attributes {stable_mosaic.version = 11 : i64} {
  func.func @_propagation_kernel(%arg0: i32, %arg1: i32, %arg2: memref<128x128xbf16, #tpu.memory_space<vmem>>, %arg3: memref<128x128xbf16, #tpu.memory_space<vmem>>, %arg4: memref<1x128x128xf32, #tpu.memory_space<vmem>>, %arg5: memref<1x1x128xf32, #tpu.memory_space<vmem>>, %arg6: memref<128x128xf32, #tpu.memory_space<vmem>>, %arg7: memref<256x128xbf16, #tpu.memory_space<vmem>>, %arg8: memref<128x128xf32, #tpu.memory_space<vmem>>) attributes {dimension_semantics = [#tpu.dimension_semantics<arbitrary>, #tpu.dimension_semantics<arbitrary>], iteration_bounds = array<i64: 2, 1>, scalar_prefetch = 0 : i64, scratch_operands = 2 : i64, tpu.core_type = #tpu.core_type<tc>, window_params = [{transform_indices = @transform_0, window_bounds = array<i64: 128, 128>}, {pipeline_mode = #tpu.pipeline_mode<synchronous>, transform_indices = @transform_1, window_bounds = array<i64: 128, 128>}, {transform_indices = @transform_2, window_bounds = array<i64: 1, 128, 128>}, {transform_indices = @transform_3, window_bounds = array<i64: 1, 1, 128>}, {transform_indices = @transform_4, window_bounds = array<i64: 128, 128>}]} {
    %c0_i32 = arith.constant 0 : i32
    %0 = arith.cmpi eq, %arg0, %c0_i32 : i32
    %c0_i32_0 = arith.constant 0 : i32
    %1 = arith.cmpi eq, %arg1, %c0_i32_0 : i32
    %2 = arith.andi %0, %1 : i1
    %3 = arith.extui %2 : i1 to i32
    %c0_i32_1 = arith.constant 0 : i32
    %4 = arith.cmpi ne, %3, %c0_i32_1 : i32
    scf.if %4 {
      %c0_24 = arith.constant 0 : index
      %c0_25 = arith.constant 0 : index
      %42 = vector.load %arg3[%c0_24, %c0_25] : memref<128x128xbf16, #tpu.memory_space<vmem>>, vector<128x128xbf16>
      %c0_26 = arith.constant 0 : index
      %c0_27 = arith.constant 0 : index
      %43 = vector.load %arg7[%c0_26, %c0_27] : memref<256x128xbf16, #tpu.memory_space<vmem>>, vector<128x128xbf16>
      tpu.vector_store %arg7[%c0_26, %c0_27], %42 {strides = array<i32>} : memref<256x128xbf16, #tpu.memory_space<vmem>>, vector<128x128xbf16>,
    } else {
    }
    %c2_i32 = arith.constant 2 : i32
    %5 = arith.remsi %arg0, %c2_i32 : i32
    %c1_i32 = arith.constant 1 : i32
    %6 = arith.addi %arg0, %c1_i32 : i32
    %c2_i32_2 = arith.constant 2 : i32
    %7 = arith.remsi %6, %c2_i32_2 : i32
    %c128_i32 = arith.constant 128 : i32
    %8 = arith.muli %5, %c128_i32 : i32
    %9 = tpu.assume_multiple %8, 128 : i32
    %c128_i32_3 = arith.constant 128 : i32
    %10 = arith.muli %7, %c128_i32_3 : i32
    %11 = tpu.assume_multiple %10, 128 : i32
    %c128_i32_4 = arith.constant 128 : i32
    %12 = arith.muli %arg1, %c128_i32_4 : i32
    %13 = tpu.assume_multiple %12, 128 : i32
    %14 = arith.index_cast %9 : i32 to index
    %c0 = arith.constant 0 : index
    %15 = vector.load %arg7[%14, %c0] : memref<256x128xbf16, #tpu.memory_space<vmem>>, vector<128x128xbf16>
    %c0_5 = arith.constant 0 : index
    %c0_6 = arith.constant 0 : index
    %16 = vector.load %arg2[%c0_5, %c0_6] : memref<128x128xbf16, #tpu.memory_space<vmem>>, vector<128x128xbf16>
    %cst = arith.constant dense<0.000000e+00> : vector<128x128xf32>
    %17 = tpu.matmul %16, %15, %cst {dimension_numbers = #tpu.dot_dimension_numbers<[1], [0], [0], [1], [0, 0, 1, 1], [], []>} : vector<128x128xbf16>, vector<128x128xbf16>, vector<128x128xf32> -> vector<128x128xf32>
    %c0_7 = arith.constant 0 : index
    %c0_8 = arith.constant 0 : index
    %c0_9 = arith.constant 0 : index
    %18 = vector.load %arg4[%c0_7, %c0_8, %c0_9] : memref<1x128x128xf32, #tpu.memory_space<vmem>>, vector<1x128x128xf32>
    %19 = vector.shape_cast %18 : vector<1x128x128xf32> to vector<128x128xf32>
    %cst_10 = arith.constant dense<0.000000e+00> : vector<128x128xf32>
    %20 = tpu.matmul %17, %19, %cst_10 {dimension_numbers = #tpu.dot_dimension_numbers<[1], [0], [0], [1], [0, 0, 1, 1], [], []>} : vector<128x128xf32>, vector<128x128xf32>, vector<128x128xf32> -> vector<128x128xf32>
    %c0_11 = arith.constant 0 : index
    %c0_12 = arith.constant 0 : index
    %c0_13 = arith.constant 0 : index
    %21 = vector.load %arg5[%c0_11, %c0_12, %c0_13] : memref<1x1x128xf32, #tpu.memory_space<vmem>>, vector<1x1x128xf32>
    %22 = vector.shape_cast %21 : vector<1x1x128xf32> to vector<1x128xf32>
    %23 = vector.broadcast %22 : vector<1x128xf32> to vector<128x128xf32>
    %24 = arith.addf %20, %23 : vector<128x128xf32>
    %25 = arith.truncf %24 : vector<128x128xf32> to vector<128x128xbf16>
    %26 = arith.addi %11, %13 : i32
    %27 = arith.index_cast %26 : i32 to index
    %c0_14 = arith.constant 0 : index
    %28 = vector.load %arg7[%27, %c0_14] : memref<256x128xbf16, #tpu.memory_space<vmem>>, vector<128x128xbf16>
    tpu.vector_store %arg7[%27, %c0_14], %25 {strides = array<i32>} : memref<256x128xbf16, #tpu.memory_space<vmem>>, vector<128x128xbf16>,
    %c1_i32_15 = arith.constant 1 : i32
    %29 = arith.cmpi eq, %arg0, %c1_i32_15 : i32
    %cst_16 = arith.constant 0.333333343 : f32
    %cst_17 = arith.constant 0.666666686 : f32
    %30 = arith.select %29, %cst_16, %cst_17 : f32
    %c0_i32_18 = arith.constant 0 : i32
    %31 = arith.cmpi eq, %arg0, %c0_i32_18 : i32
    %32 = arith.extui %31 : i1 to i32
    %c0_i32_19 = arith.constant 0 : i32
    %33 = arith.cmpi ne, %32, %c0_i32_19 : i32
    scf.if %33 {
      %cst_24 = arith.constant 0.000000e+00 : f32
      %42 = vector.broadcast %cst_24 : f32 to vector<128x128xf32>
      %43 = arith.index_cast %13 : i32 to index
      %c0_25 = arith.constant 0 : index
      %44 = vector.load %arg8[%43, %c0_25] : memref<128x128xf32, #tpu.memory_space<vmem>>, vector<128x128xf32>
      tpu.vector_store %arg8[%43, %c0_25], %42 {strides = array<i32>} : memref<128x128xf32, #tpu.memory_space<vmem>>, vector<128x128xf32>,
    } else {
    }
    %34 = arith.index_cast %13 : i32 to index
    %c0_20 = arith.constant 0 : index
    %35 = vector.load %arg8[%34, %c0_20] : memref<128x128xf32, #tpu.memory_space<vmem>>, vector<128x128xf32>
    %36 = vector.broadcast %30 : f32 to vector<128x128xf32>
    %37 = arith.mulf %36, %24 : vector<128x128xf32>
    %38 = arith.addf %35, %37 : vector<128x128xf32>
    %39 = arith.index_cast %13 : i32 to index
    %c0_21 = arith.constant 0 : index
    %40 = vector.load %arg8[%39, %c0_21] : memref<128x128xf32, #tpu.memory_space<vmem>>, vector<128x128xf32>
    tpu.vector_store %arg8[%39, %c0_21], %38 {strides = array<i32>} : memref<128x128xf32, #tpu.memory_space<vmem>>, vector<128x128xf32>,
    %c0_22 = arith.constant 0 : index
    %c0_23 = arith.constant 0 : index
    %41 = vector.load %arg6[%c0_22, %c0_23] : memref<128x128xf32, #tpu.memory_space<vmem>>, vector<128x128xf32>
    tpu.vector_store %arg6[%c0_22, %c0_23], %38 {strides = array<i32>} : memref<128x128xf32, #tpu.memory_space<vmem>>, vector<128x128xf32>,
    return
  }
  func.func @transform_0(%arg0: i32, %arg1: i32) -> (i32, i32) {
    %c0_i32 = arith.constant 0 : i32
    %c0_i32_0 = arith.constant 0 : i32
    return %arg1, %c0_i32 : i32, i32
  }
  func.func @transform_1(%arg0: i32, %arg1: i32) -> (i32, i32) {
    %c0_i32 = arith.constant 0 : i32
    %c0_i32_0 = arith.constant 0 : i32
    %c0_i32_1 = arith.constant 0 : i32
    return %c0_i32, %c0_i32_0 : i32, i32
  }
  func.func @transform_2(%arg0: i32, %arg1: i32) -> (i32, i32, i32) {
    %c0_i32 = arith.constant 0 : i32
    %c0_i32_0 = arith.constant 0 : i32
    %c0_i32_1 = arith.constant 0 : i32
    return %arg0, %c0_i32, %c0_i32_0 : i32, i32, i32
  }
  func.func @transform_3(%arg0: i32, %arg1: i32) -> (i32, i32, i32) {
    %c0_i32 = arith.constant 0 : i32
    %c0_i32_0 = arith.constant 0 : i32
    %c0_i32_1 = arith.constant 0 : i32
    return %arg0, %c0_i32, %c0_i32_0 : i32, i32, i32
  }
  func.func @transform_4(%arg0: i32, %arg1: i32) -> (i32, i32) {
    %c0_i32 = arith.constant 0 : i32
    %c0_i32_0 = arith.constant 0 : i32
    return %arg1, %c0_i32 : i32, i32
  }
}

module attributes {stable_mosaic.version = 11 : i64} {
  func.func @_rating_kernel(%arg0: i32, %arg1: memref<8x128xf32, #tpu.memory_space<vmem>>, %arg2: memref<128x128xf32, #tpu.memory_space<vmem>>, %arg3: memref<8x128xf32, #tpu.memory_space<vmem>>, %arg4: memref<128x128xf32, #tpu.memory_space<vmem>>, %arg5: memref<8x128xf32, #tpu.memory_space<vmem>>) attributes {dimension_semantics = [#tpu.dimension_semantics<arbitrary>], iteration_bounds = array<i64: 1>, scalar_prefetch = 0 : i64, scratch_operands = 0 : i64, tpu.core_type = #tpu.core_type<tc>, window_params = [{pipeline_mode = #tpu.pipeline_mode<synchronous>, transform_indices = @transform_0, window_bounds = array<i64: 8, 128>}, {pipeline_mode = #tpu.pipeline_mode<synchronous>, transform_indices = @transform_1, window_bounds = array<i64: 128, 128>}, {pipeline_mode = #tpu.pipeline_mode<synchronous>, transform_indices = @transform_2, window_bounds = array<i64: 8, 128>}, {pipeline_mode = #tpu.pipeline_mode<synchronous>, transform_indices = @transform_3, window_bounds = array<i64: 128, 128>}, {pipeline_mode = #tpu.pipeline_mode<synchronous>, transform_indices = @transform_4, window_bounds = array<i64: 8, 128>}]} {
    %c0 = arith.constant 0 : index
    %c0_0 = arith.constant 0 : index
    %0 = vector.load %arg1[%c0, %c0_0] : memref<8x128xf32, #tpu.memory_space<vmem>>, vector<8x128xf32>
    %c0_1 = arith.constant 0 : index
    %c0_2 = arith.constant 0 : index
    %1 = vector.load %arg2[%c0_1, %c0_2] : memref<128x128xf32, #tpu.memory_space<vmem>>, vector<128x128xf32>
    %cst = arith.constant dense<0.000000e+00> : vector<8x128xf32>
    %2 = tpu.matmul %0, %1, %cst {dimension_numbers = #tpu.dot_dimension_numbers<[1], [1], [0], [0], [0, 0, 1, 0], [], []>} : vector<8x128xf32>, vector<128x128xf32>, vector<8x128xf32> -> vector<8x128xf32>
    %c0_3 = arith.constant 0 : index
    %c0_4 = arith.constant 0 : index
    %3 = vector.load %arg3[%c0_3, %c0_4] : memref<8x128xf32, #tpu.memory_space<vmem>>, vector<8x128xf32>
    %c0_5 = arith.constant 0 : index
    %c0_6 = arith.constant 0 : index
    %4 = vector.load %arg4[%c0_5, %c0_6] : memref<128x128xf32, #tpu.memory_space<vmem>>, vector<128x128xf32>
    %cst_7 = arith.constant dense<0.000000e+00> : vector<8x128xf32>
    %5 = tpu.matmul %3, %4, %cst_7 {dimension_numbers = #tpu.dot_dimension_numbers<[1], [1], [0], [0], [0, 0, 1, 0], [], []>} : vector<8x128xf32>, vector<128x128xf32>, vector<8x128xf32> -> vector<8x128xf32>
    %6 = arith.negf %2 : vector<8x128xf32>
    %7 = math.exp %6 : vector<8x128xf32>
    %cst_8 = arith.constant 1.000000e+00 : f32
    %8 = vector.broadcast %cst_8 : f32 to vector<8x128xf32>
    %9 = arith.addf %8, %7 : vector<8x128xf32>
    %10 = arith.divf %8, %9 : vector<8x128xf32>
    %11 = arith.negf %5 : vector<8x128xf32>
    %12 = math.exp %11 : vector<8x128xf32>
    %cst_9 = arith.constant 1.000000e+00 : f32
    %13 = vector.broadcast %cst_9 : f32 to vector<8x128xf32>
    %14 = arith.addf %13, %12 : vector<8x128xf32>
    %15 = arith.divf %13, %14 : vector<8x128xf32>
    %cst_10 = arith.constant 5.000000e-01 : f32
    %16 = vector.broadcast %cst_10 : f32 to vector<8x128xf32>
    %17 = arith.mulf %16, %15 : vector<8x128xf32>
    %18 = arith.addf %10, %17 : vector<8x128xf32>
    %c0_11 = arith.constant 0 : index
    %c0_12 = arith.constant 0 : index
    %19 = vector.load %arg5[%c0_11, %c0_12] : memref<8x128xf32, #tpu.memory_space<vmem>>, vector<8x128xf32>
    tpu.vector_store %arg5[%c0_11, %c0_12], %18 {strides = array<i32>} : memref<8x128xf32, #tpu.memory_space<vmem>>, vector<8x128xf32>,
    return
  }
  func.func @transform_0(%arg0: i32) -> (i32, i32) {
    %c0_i32 = arith.constant 0 : i32
    %c0_i32_0 = arith.constant 0 : i32
    %c0_i32_1 = arith.constant 0 : i32
    return %c0_i32, %c0_i32_0 : i32, i32
  }
  func.func @transform_1(%arg0: i32) -> (i32, i32) {
    %c0_i32 = arith.constant 0 : i32
    %c0_i32_0 = arith.constant 0 : i32
    %c0_i32_1 = arith.constant 0 : i32
    return %c0_i32, %c0_i32_0 : i32, i32
  }
  func.func @transform_2(%arg0: i32) -> (i32, i32) {
    %c0_i32 = arith.constant 0 : i32
    %c0_i32_0 = arith.constant 0 : i32
    %c0_i32_1 = arith.constant 0 : i32
    return %c0_i32, %c0_i32_0 : i32, i32
  }
  func.func @transform_3(%arg0: i32) -> (i32, i32) {
    %c0_i32 = arith.constant 0 : i32
    %c0_i32_0 = arith.constant 0 : i32
    %c0_i32_1 = arith.constant 0 : i32
    return %c0_i32, %c0_i32_0 : i32, i32
  }
  func.func @transform_4(%arg0: i32) -> (i32, i32) {
    %c0_i32 = arith.constant 0 : i32
    %c0_i32_0 = arith.constant 0 : i32
    %c0_i32_1 = arith.constant 0 : i32
    return %c0_i32, %c0_i32_0 : i32, i32
  }
}

</mosaic_0001>

<bundles_post_ra>
// kernel: asfgnn_forward.2
= control target key start
LH: loop header
LB: loop body
LE: loop exit
PB: predicated region body
PF: predicated region fallthrough
CT: control target
= control target key end

     0   :  { %9 = vsyncpa [#allocation5], 0  ;;  %s1866_s0 = inlined_call_operand.hbm [shape: bf16[128,128], index: 0, kind: input, shape index: {}]   ;;  %s1867_s1 = inlined_call_operand.hbm [shape: bf16[128,128], index: 1, kind: input, shape index: {}]   ;;  %s1868_s2 = inlined_call_operand.hbm [shape: f32[2,128,128], index: 2, kind: input, shape index: {}]   ;;  %s1869_s3 = inlined_call_operand.vmem [shape: f32[2,1,128], index: 3, kind: input, shape index: {}]   ;;  %s1870_s4 = inlined_call_operand.vmem [shape: f32[128,128], index: 4, kind: output, shape index: {}]  }
   0x1   :  { %10 = vsyncpa [#allocation7], 0  ;;  %s1561_s15 = smov 0   ;;  %s1563_s16 = smov 0  }
   0x2   :  { %s1565_s17 = smov 0   ;;  %s1567_s18 = smov 0  }
   0x3   :  { %s1569_s19 = smov 0   ;;  %s1571_s20 = smov 0  }
   0x4 LB: > { %s1033_s21 = sadd.s32 4294967295, %s1526_s20   ;;  %p89_p0 = scmp.ne.s32.totalorder %s1514_s17, %s1510_s16  ;;  %s1526_s20 = sphi %s1571_s20, %s16_s20   ;;  %s1522_s19 = sphi %s1569_s19, %s1882_s19   ;;  %s1518_s18 = sphi %s1567_s18, %s1881_s18   ;;  %s1514_s17 = sphi %s1565_s17, %s1880_s17   ;;  %s1510_s16 = sphi %s1563_s16, %s1879_s16   ;;  %s1506_s15 = sphi %s1561_s15, %s1878_s15  }
   0x5   : > { %p90_p1 = scmp.eq.s32.totalorder %s1526_s20, 0  ;;  %p95_p2 = scmp.ne.s32.totalorder %s1510_s16, %s1506_s15 }
   0x6   : > { %p1596_p3 = scmp.eq.s32.totalorder %s1033_s21, 0  ;;  %p1034_p4 = scmp.ge.s32.totalorder %s1526_s20, 1 }
   0x7   : > { %p91_p5 = por %p90_p1, %p89_p0  ;;  %p158_p6 = scmp.lt.s32.totalorder %s1526_s20, 3 }
   0x8   : > { %p1604_p7 = por %p1596_p3, %p95_p2  ;;  %s1528_s25 = smov [#allocation4]  }
   0x9   : > { %p1608_p8 = pnand %p1034_p4, %p158_p6  ;;  %s173_s26 = sshll.u32 %s1528_s25, 4  ;;  %s174_s26 = int_to_ptr.vmem [resolvable:$true] %s173_s26 }
   0xa   : > { %s1873_s23 = scalar_select %p1604_p7, 1, 0 }
   0xb   : > { %p1301_p9 = pneg %p1608_p8  ;;  %p1314_p11 = scmp.lt.s32.totalorder %s1526_s20, 2 }
   0xc   : > { %s1399_s29 = scalar_lea.vmem %s174_s26, 1024  ;;  %p1407_p4 = scmp.lt.s32.totalorder %s174_s26, %s174_s26 }
   0xd   : > { %p1616_p10 = pnand %p1301_p9, %p1596_p3  ;;  %p1621_p12 = pnand %p1314_p11, %p91_p5 }
   0xe   : > { %p1400_p0 = scmp.ne.s32.totalorder %s174_s26, %s1399_s29  ;;  %p1408_p6 = scmp.lt.s32.totalorder %s1399_s29, %s1399_s29 }
   0xf   : > { %p1390_p13 = pneg %p1616_p10 }
  0x10   : > { %p1409_p9 = por %p1408_p6, %p1407_p4 }
  0x11   : > { %p1402_p1 = pnand %p1400_p0, %p1390_p13 }
  0x13   : > { %p1403_p2 = pneg %p1402_p1 }
  0x15   : > { %p1410_p7 = pnand %p1409_p9, %p1403_p2 }
  0x17   : > { %1413 = shalt.err (!%p1410_p7)
}
  0x18   : > { %s1529_s30 = smov 64   ;;  %s1530_s5 = smov 4  }
  0x19   : > { %1304 = dma.hbm_to_vmem [thread:$0]  (!%p1616_p10), %s1866_s0, 1024, %s174_s26, [#allocation5], %s1529_s30, %s1529_s30, %s1530_s5  }
  0x1a   : > { %s1531_s8 = smov [#allocation6]  }
  0x1b   : > { %s186_s9 = sshll.u32 %s1531_s8, 4  ;;  %s187_s9 = int_to_ptr.vmem [resolvable:$true] %s186_s9 }
  0x1c   : > { %s1425_s10 = scalar_lea.vmem %s187_s9, 1024  ;;  %p1433_p1 = scmp.lt.s32.totalorder %s187_s9, %s187_s9 }
  0x1d   : > { %p1426_p5 = scmp.ne.s32.totalorder %s187_s9, %s1425_s10  ;;  %p1434_p7 = scmp.lt.s32.totalorder %s1425_s10, %s1425_s10 }
  0x1f   : > { %p1428_p11 = pnand %p1426_p5, %p1390_p13  ;;  %p1435_p2 = por %p1434_p7, %p1433_p1 }
  0x21   : > { %p1429_p0 = pneg %p1428_p11 }
  0x23   : > { %p1436_p4 = pnand %p1435_p2, %p1429_p0 }
  0x25   : > { %1439 = shalt.err (!%p1436_p4)
}
  0x26   : > { %1307 = dma.hbm_to_vmem [thread:$0]  (!%p1616_p10), %s1867_s1, 1024, %s187_s9, [#allocation7], %s1529_s30, %s1529_s30, %s1530_s5  }
  0x27   : > { %s28_s13 = sadd.s32 1, %s1522_s19  ;;  %s82_s14 = sadd.s32 1, %s1514_s17 }
  0x28   : > { %p30_p13 = scmp.ge.s32.totalorder %s28_s13, 2  ;;  %s200_s15 = sand.u32 1, %s1526_s20  }
  0x29   : > { %s202_s25 = sand.u32 1, %s1514_s17   ;;  %s1090_s27 = sshll.u32 %s1522_s19, 11 }
  0x2a   : > { %s1884_s13 = smov (%p30_p13, %s28_s13), 0  ;;  %s1038_s26 = sshll.u32 %s202_s25, 7 }
  0x2b   : > { %s79_s29 = ssub.s32 %s1522_s19, %s1884_s13  ;;  %s210_s8 = scalar_lea.hbm %s1868_s2, %s1090_s27 }
  0x2c   : > { %p80_p6 = scmp.eq.s32.totalorder %s79_s29, 0  ;;  %s204_s10 = scalar_lea.vmem [#allocation8], %s1038_s26 }
  0x2d   : > { %s211_s11 = sshll.u32 %s204_s10, 4  ;;  %s201_s5 = scalar_lea.sflag [#allocation5], %s200_s15  ;;  %s212_s11 = int_to_ptr.vmem [resolvable:$true] %s211_s11 }
  0x2e   : > { %s1656_s30 = scalar_select %p80_p6, %s1514_s17, %s82_s14  }
  0x2f   : > { %p1442_p10 = pneg %p1621_p12  ;;  %s1453_s9 = scalar_lea.vmem %s212_s11, 2048 }
  0x30   : > { %p1454_p9 = scmp.ne.s32.totalorder %s212_s11, %s1453_s9  ;;  %s1532_s12 = smov [#allocation8]  }
  0x31   : > { %s1458_s25 = sshll.u32 %s1532_s12, 4  ;;  %s1459_s25 = int_to_ptr.vmem [resolvable:$false] %s1458_s25 }
  0x32   : > { %p1456_p5 = pnand %p1454_p9, %p1442_p10  ;;  %s1460_s29 = scalar_lea.vmem %s1459_s25, 4096 }
  0x33   : > { %p1461_p0 = scmp.lt.s32.totalorder %s212_s11, %s1459_s25  ;;  %p1462_p1 = scmp.lt.s32.totalorder %s1460_s29, %s1453_s9 }
  0x34   : > { %p1457_p11 = pneg %p1456_p5 }
  0x35   : > { %p1463_p7 = por %p1462_p1, %p1461_p0 }
  0x37   : > { %p1464_p2 = pnand %p1463_p7, %p1457_p11 }
  0x39   : > { %1467 = shalt.err (!%p1464_p2)
}
  0x3a   : > { %s1533_s26 = smov 128   ;;  %s1534_s14 = smov 8  }
  0x3b   : > { %1311 = dma.hbm_to_vmem [thread:$0]  (!%p1621_p12), %s210_s8, 2048, %s212_s11, %s201_s5, %s1533_s26, %s1533_s26, %s1534_s14  }
  0x3c   : > { %229 = sbr.rel (%p1608_p8) target bundleno = 580 (0x244), region = 36 }
  0x41   : > { %1493 = dma.done.wait (%p1596_p3), [#allocation5], 1024  }
  0x42   : > { %1495 = vsyncadd (%p1596_p3), [#allocation5], 4294966272 }
  0x43   : > { %1497 = dma.done.wait (%p1596_p3), [#allocation7], 1024  }
  0x44   : > { %1499 = vsyncadd (%p1596_p3), [#allocation7], 4294966272  ;;  %s239_s28 = sand.u32 1, %s1033_s21   ;;  %s241_s15 = sand.u32 1, %s1510_s16  }
  0x45   : > { %s1044_s24 = sshll.u32 %s241_s15, 7  ;;  %s240_s27 = scalar_lea.sflag [#allocation5], %s239_s28 }
  0x46   : > { %s1675_s6 = scalar_lea.vmem [#allocation8], %s1044_s24  ;;  %p1877_p8 = scmp.ne.s32.totalorder %s1873_s23, 0 }
  0x48   : > { %1501 = dma.done.wait (%p1877_p8), %s240_s27, 2048  }
  0x49   : > { %1503 = vsyncadd (%p1877_p8), %s240_s27, 4294965248  ;;  %p272_p12 = scmp.lt.s32.totalorder %s1518_s18, 1  ;;  %p282_p3 = scmp.eq.s32.totalorder %s1518_s18, 0 }
  0x4a   : > { %v288_v0 = vld [vmem:[#allocation6] sm:$0xff] (%p282_p3)   ;;  %v290_v1 = vld [vmem:[#allocation6 + $0x8] sm:$0xff] (%p282_p3)   ;;  %v292_v2 = vld [vmem:[#allocation6 + $0x10] sm:$0xff] (%p282_p3)  }
  0x4b   : > { %s1684_s22 = scalar_select %p272_p12, %s1518_s18, 1  ;;  %304 = vst [vmem:[#allocation2] sm:$0xff] (%p282_p3), %v288_v0   ;;  %306 = vst [vmem:[#allocation2 + $0x8] sm:$0xff] (%p282_p3), %v290_v1   ;;  %v294_v3 = vld [vmem:[#allocation6 + $0x18] sm:$0xff] (%p282_p3)   ;;  %v296_v4 = vld [vmem:[#allocation6 + $0x20] sm:$0xff] (%p282_p3)  }
  0x4c   : > { %287 = sbr.rel (!%p282_p3) target bundleno = 81 (0x51), region = 52  ;;  %308 = vst [vmem:[#allocation2 + $0x10] sm:$0xff] (%p282_p3), %v292_v2   ;;  %v298_v5 = vld [vmem:[#allocation6 + $0x28] sm:$0xff] (%p282_p3)   ;;  %310 = vst [vmem:[#allocation2 + $0x18] sm:$0xff] (%p282_p3), %v294_v3   ;;  %v300_v6 = vld [vmem:[#allocation6 + $0x30] sm:$0xff] (%p282_p3)  }
  0x4d   : > { %s274_s8 = scalar_lea.vmem %s1869_s3, %s1684_s22  ;;  %312 = vst [vmem:[#allocation2 + $0x20] sm:$0xff] (%p282_p3), %v296_v4   ;;  %314 = vst [vmem:[#allocation2 + $0x28] sm:$0xff] (%p282_p3), %v298_v5   ;;  %v302_v7 = vld [vmem:[#allocation6 + $0x38] sm:$0xff] (%p282_p3)  }
  0x4e   : > { %316 = vst [vmem:[#allocation2 + $0x30] sm:$0xff] (%p282_p3), %v300_v6   ;;  %318 = vst [vmem:[#allocation2 + $0x38] sm:$0xff] (%p282_p3), %v302_v7  }
  0x51 PF: > { %p320_p4 = scmp.lt.s32.totalorder %s1518_s18, 0  ;;  %s321_s23 = ssub.s32 0, %s1518_s18  ;;  %v1380_v8 = vld [vmem:[#allocation4] sm:$0xff]   ;;  %v580_v9 = vld [vmem:[%s1675_s6 + $0x78] sm:$0xff]  ;;  %v579_v10 = vld [vmem:[%s1675_s6 + $0x70] sm:$0xff] }
  0x52   : > { %s1046_s10 = smin.u32 %s1518_s18, %s321_s23  ;;  %1219 = vmatprep.mubr.bf16.mxu0 %v1380_v8  ;;  %1235 = vmatprep.subr.mxu1 %v580_v9  ;;  %v578_v11 = vld [vmem:[%s1675_s6 + $0x68] sm:$0xff]  ;;  %v577_v14 = vld [vmem:[%s1675_s6 + $0x60] sm:$0xff]  ;;  %v576_v15 = vld [vmem:[%s1675_s6 + $0x58] sm:$0xff]  ;;  %p818_p13 = scmp.eq.s32.totalorder %s1518_s18, 1 }
  0x53   : > { %s323_s11 = sand.u32 1, %s1046_s10   ;;  %1236 = vmatpush3.msra.mxu1 %v580_v9  ;;  %v575_v18 = vld [vmem:[%s1675_s6 + $0x50] sm:$0xff]  ;;  %v574_v19 = vld [vmem:[%s1675_s6 + $0x48] sm:$0xff]  ;;  %v573_v20 = vld [vmem:[%s1675_s6 + $0x40] sm:$0xff]  ;;  %s326_s14 = sadd.s32 1, %s1518_s18 }
  0x54   : > { %s324_s5 = ssub.s32 0, %s323_s11  ;;  %1237 = vmatprep.subr.mxu1 %v579_v10  ;;  %v572_v22 = vld [vmem:[%s1675_s6 + $0x38] sm:$0xff]  ;;  %v571_v23 = vld [vmem:[%s1675_s6 + $0x30] sm:$0xff]  ;;  %v570_v25 = vld [vmem:[%s1675_s6 + $0x28] sm:$0xff]  ;;  %s328_s28 = ssub.s32 0, %s326_s14 }
  0x55   : > { %s1886_s5 = smov (!%p320_p4, %s324_s5), %s323_s11  ;;  %1238 = vmatpush3.msra.mxu1 %v579_v10  ;;  %v569_v26 = vld [vmem:[%s1675_s6 + $0x20] sm:$0xff]  ;;  %v568_v28 = vld [vmem:[%s1675_s6 + $0x18] sm:$0xff]  ;;  %v1381_v30 = vld [vmem:[#allocation4 + $0x8] sm:$0xff]   ;;  %s1047_s15 = smin.u32 %s328_s28, %s326_s14 }
  0x56   : > { %s1048_s9 = sshll.u32 %s1886_s5, 7  ;;  %1239 = vmatprep.subr.mxu1 %v578_v11  ;;  %v1382_v31 = vld [vmem:[#allocation4 + $0x10] sm:$0xff]   ;;  %v1383_v32 = vld [vmem:[#allocation4 + $0x18] sm:$0xff]   ;;  %v1384_v33 = vld [vmem:[#allocation4 + $0x20] sm:$0xff]   ;;  %s330_s24 = sand.u32 1, %s1047_s15  }
  0x57   : > { %s336_s12 = sshra.s32 %s1048_s9, 3  ;;  %1240 = vmatpush3.msra.mxu1 %v578_v11  ;;  %v1385_v34 = vld [vmem:[#allocation4 + $0x28] sm:$0xff]   ;;  %v1386_v35 = vld [vmem:[#allocation4 + $0x30] sm:$0xff]   ;;  %v1387_v36 = vld [vmem:[#allocation4 + $0x38] sm:$0xff]   ;;  %p327_p6 = scmp.lt.s32.totalorder %s326_s14, 0 }
  0x58   : > { %s1050_s25 = sshll.u32 %s336_s12, 2  ;;  %1241 = vmatprep.subr.mxu1 %v577_v14  ;;  %v567_v37 = vld [vmem:[%s1675_s6 + $0x10] sm:$0xff]  ;;  %v566_v38 = vld [vmem:[%s1675_s6 + $0x8] sm:$0xff]  ;;  %v565_v39 = vld [vmem:[%s1675_s6] sm:$0xff]  ;;  %s331_s27 = ssub.s32 0, %s330_s24 }
  0x59   : > { %s1696_s29 = scalar_lea.vmem [#allocation2], %s1050_s25  ;;  %1242 = vmatpush3.msra.mxu1 %v577_v14  ;;  %s1888_s27 = smov (!%p327_p6, %s331_s27), %s330_s24  ;;  %v1067_v57 = vld [vmem:[%s274_s8] ss:$0 sm:$0xff] }
  0x5a   : > { %v1372_v12 = vld [vmem:[%s1696_s29 + $0x38] sm:$0xff]   ;;  %v1373_v13 = vld [vmem:[%s1696_s29 + $0x30] sm:$0xff]   ;;  %v1374_v16 = vld [vmem:[%s1696_s29 + $0x28] sm:$0xff]   ;;  %1243 = vmatprep.subr.mxu1 %v576_v15  ;;  %s1049_s6 = sshll.u32 %s1888_s27, 7  ;;  %p1085_p10 = scmp.ne.s32.totalorder %s1518_s18, 0 }
  0x5b   : > { %1203 = vmatprep.subr.bf16.mxu0 %v1372_v12  ;;  %v1375_v17 = vld [vmem:[%s1696_s29 + $0x20] sm:$0xff]   ;;  %1244 = vmatpush3.msra.mxu1 %v576_v15  ;;  %v1376_v21 = vld [vmem:[%s1696_s29 + $0x18] sm:$0xff]   ;;  %v1377_v24 = vld [vmem:[%s1696_s29 + $0x10] sm:$0xff]   ;;  %s798_s7 = sshra.s32 %s1049_s6, 3 }
  0x5c   : > { %1204 = vmatpush3.bf16.msra.mxu0 %v1372_v12  ;;  %1245 = vmatprep.subr.mxu1 %v575_v18  ;;  %v1378_v27 = vld [vmem:[%s1696_s29 + $0x8] sm:$0xff]   ;;  %v1379_v29 = vld [vmem:[%s1696_s29] sm:$0xff]   ;;  %s1720_s26 = scalar_select %p818_p13, 0.33333334, 0.6666667 }
  0x5d   : > { %1205 = vmatprep.subr.bf16.mxu0 %v1373_v13  ;;  %1246 = vmatpush3.msra.mxu1 %v575_v18  ;;  %s1084_s10 = sshll.u32 %s798_s7, 2 }
  0x5e   : > { %1247 = vmatprep.subr.mxu1 %v574_v19  ;;  %s1734_s11 = scalar_lea.vmem [#allocation2], %s1084_s10 }
  0x5f   : > { %1248 = vmatpush3.msra.mxu1 %v574_v19 }
  0x60   : > { %1206 = vmatpush3.bf16.msra.mxu0 %v1373_v13  ;;  %1249 = vmatprep.subr.mxu1 %v573_v20 }
  0x61   : > { %1207 = vmatprep.subr.bf16.mxu0 %v1374_v16  ;;  %1250 = vmatpush3.msra.mxu1 %v573_v20 }
  0x62   : > { %1251 = vmatprep.subr.mxu1 %v572_v22 }
  0x63   : > { %1252 = vmatpush3.msra.mxu1 %v572_v22 }
  0x64   : > { %1208 = vmatpush3.bf16.msra.mxu0 %v1374_v16  ;;  %1253 = vmatprep.subr.mxu1 %v571_v23 }
  0x65   : > { %1209 = vmatprep.subr.bf16.mxu0 %v1375_v17  ;;  %1254 = vmatpush3.msra.mxu1 %v571_v23 }
  0x66   : > { %1255 = vmatprep.subr.mxu1 %v570_v25 }
  0x67   : > { %1256 = vmatpush3.msra.mxu1 %v570_v25 }
  0x68   : > { %1210 = vmatpush3.bf16.msra.mxu0 %v1375_v17  ;;  %1257 = vmatprep.subr.mxu1 %v569_v26 }
  0x69   : > { %1211 = vmatprep.subr.bf16.mxu0 %v1376_v21  ;;  %1258 = vmatpush3.msra.mxu1 %v569_v26 }
  0x6a   : > { %1259 = vmatprep.subr.mxu1 %v568_v28 }
  0x6b   : > { %1260 = vmatpush3.msra.mxu1 %v568_v28 }
  0x6c   : > { %1212 = vmatpush3.bf16.msra.mxu0 %v1376_v21  ;;  %1261 = vmatprep.subr.mxu1 %v567_v37 }
  0x6d   : > { %1213 = vmatprep.subr.bf16.mxu0 %v1377_v24  ;;  %1262 = vmatpush3.msra.mxu1 %v567_v37 }
  0x6e   : > { %1263 = vmatprep.subr.mxu1 %v566_v38 }
  0x6f   : > { %1264 = vmatpush3.msra.mxu1 %v566_v38 }
  0x70   : > { %1214 = vmatpush3.bf16.msra.mxu0 %v1377_v24  ;;  %1265 = vmatprep.subr.mxu1 %v565_v39 }
  0x71   : > { %1215 = vmatprep.subr.bf16.mxu0 %v1378_v27  ;;  %1266 = vmatpush3.msra.mxu1 %v565_v39 }
  0x74   : > { %1216 = vmatpush3.bf16.msra.mxu0 %v1378_v27 }
  0x75   : > { %1217 = vmatprep.subr.bf16.mxu0 %v1379_v29 }
  0x78   : > { %1218 = vmatpush3.bf16.msra.mxu0 %v1379_v29 }
  0x7b   : > { %1220 = vmatmul.mubr.bf16.vlgmr.msra.gmra.mxu0 %v1381_v30 }
  0x7c   : > { %1223 = vmatprep.mubr.bf16.mxu0 %v1382_v31 }
  0x83   : > { %1224 = vmatmul.mubr.bf16.gmra.mxu0 %v1383_v32 }
  0x84   : > { %1227 = vmatprep.mubr.bf16.mxu0 %v1384_v33 }
  0x8b   : > { %1228 = vmatmul.mubr.bf16.gmra.mxu0 %v1385_v34 }
  0x8c   : > { %1231 = vmatprep.mubr.bf16.mxu0 %v1386_v35 }
  0x93   : > { %1232 = vmatmul.mubr.bf16.gmra.mxu0 %v1387_v36 }
 0x13b   : > { %v1221_v40 = vpop.f32.mrf.mxu0 }
 0x13d   : > { %v502_v41 = vpop.f32.mrf.mxu0 }
 0x13e   : > { %1267 = vmatprep.mubr.f32.mxu1 %v502_v41 }
 0x13f   : > { %v1222_v42 = vpop.f32.mrf.mxu0 }
 0x141   : > { %v505_v43 = vpop.f32.mrf.mxu0 }
 0x142   : > { %1268 = vmatmul.mubr.f32.vlgmr.msra.gmra.mxu1 %v505_v43 }
 0x143   : > { %v1225_v44 = vpop.f32.mrf.mxu0  ;;  %1270 = vmatprep.mubr.f32.mxu1 %v1221_v40 }
 0x145   : > { %v518_v45 = vpop.f32.mrf.mxu0 }
 0x146   : > { %1271 = vmatmul.mubr.f32.gmra.mxu1 %v1222_v42 }
 0x147   : > { %v1226_v46 = vpop.f32.mrf.mxu0  ;;  %1273 = vmatprep.mubr.f32.mxu1 %v518_v45 }
 0x149   : > { %v521_v47 = vpop.f32.mrf.mxu0 }
 0x14a   : > { %1274 = vmatmul.mubr.f32.gmra.mxu1 %v521_v47 }
 0x14b   : > { %v1229_v48 = vpop.f32.mrf.mxu0  ;;  %1276 = vmatprep.mubr.f32.mxu1 %v1225_v44 }
 0x14d   : > { %v534_v49 = vpop.f32.mrf.mxu0 }
 0x14e   : > { %1277 = vmatmul.mubr.f32.gmra.mxu1 %v1226_v46 }
 0x14f   : > { %v1230_v50 = vpop.f32.mrf.mxu0  ;;  %1279 = vmatprep.mubr.f32.mxu1 %v534_v49 }
 0x151   : > { %v537_v51 = vpop.f32.mrf.mxu0 }
 0x152   : > { %1280 = vmatmul.mubr.f32.gmra.mxu1 %v537_v51 }
 0x153   : > { %v1233_v52 = vpop.f32.mrf.mxu0  ;;  %1282 = vmatprep.mubr.f32.mxu1 %v1229_v48 }
 0x155   : > { %v550_v53 = vpop.f32.mrf.mxu0 }
 0x156   : > { %1283 = vmatmul.mubr.f32.gmra.mxu1 %v1230_v50 }
 0x157   : > { %v1234_v54 = vpop.f32.mrf.mxu0  ;;  %1285 = vmatprep.mubr.f32.mxu1 %v550_v53 }
 0x159   : > { %v553_v55 = vpop.f32.mrf.mxu0 }
 0x15a   : > { %1286 = vmatmul.mubr.f32.gmra.mxu1 %v553_v55 }
 0x15b   : > { %1288 = vmatprep.mubr.f32.mxu1 %v1233_v52 }
 0x15e   : > { %1289 = vmatmul.mubr.f32.gmra.mxu1 %v1234_v54 }
 0x202   : > { %v1269_v56 = vpop.f32.mrf.mxu1 }
 0x203   : > { %v1728_v59 = vadd.f32 %v1269_v56, %v1067_v57 }
 0x204   : > { %v654_v58 = vpop.f32.mrf.mxu1 }
 0x205   : > { %v1730_v60 = vadd.f32 %v1067_v57, %v654_v58 }
 0x206   : > { %v1272_v61 = vpop.f32.mrf.mxu1 }
 0x207   : > { %v1111_v62 = vpack.c.bf16 %v1728_v59, %v1730_v60  ;;  %v1737_v0 = vadd.f32 %v1272_v61, %v1067_v57 }
 0x208   : > { %v664_v63 = vpop.f32.mrf.mxu1 }
 0x209   : > { %1112 = vst [vmem:[%s1734_s11] sm:$0xff] %v1111_v62   ;;  %v1739_v1 = vadd.f32 %v1067_v57, %v664_v63 }
 0x20a   : > { %v1275_v2 = vpop.f32.mrf.mxu1 }
 0x20b   : > { %v1116_v3 = vpack.c.bf16 %v1737_v0, %v1739_v1  ;;  %v1744_v5 = vadd.f32 %v1275_v2, %v1067_v57 }
 0x20c   : > { %v674_v4 = vpop.f32.mrf.mxu1 }
 0x20d   : > { %1148 = vst [vmem:[%s1734_s11 + $0x8] sm:$0xff] %v1116_v3   ;;  %v1746_v6 = vadd.f32 %v1067_v57, %v674_v4 }
 0x20e   : > { %v1278_v7 = vpop.f32.mrf.mxu1 }
 0x20f   : > { %v1121_v8 = vpack.c.bf16 %v1744_v5, %v1746_v6  ;;  %v1751_v10 = vadd.f32 %v1278_v7, %v1067_v57 }
 0x210   : > { %v684_v9 = vpop.f32.mrf.mxu1 }
 0x211   : > { %1149 = vst [vmem:[%s1734_s11 + $0x10] sm:$0xff] %v1121_v8   ;;  %v685_v11 = vadd.f32 %v1067_v57, %v684_v9 }
 0x212   : > { %v1281_v12 = vpop.f32.mrf.mxu1 }
 0x213   : > { %v1126_v13 = vpack.c.bf16 %v1751_v10, %v685_v11  ;;  %v1755_v15 = vadd.f32 %v1281_v12, %v1067_v57 }
 0x214   : > { %v694_v14 = vpop.f32.mrf.mxu1 }
 0x215   : > { %1150 = vst [vmem:[%s1734_s11 + $0x18] sm:$0xff] %v1126_v13   ;;  %v1757_v16 = vadd.f32 %v1067_v57, %v694_v14 }
 0x216   : > { %v1284_v17 = vpop.f32.mrf.mxu1 }
 0x217   : > { %v1131_v18 = vpack.c.bf16 %v1755_v15, %v1757_v16  ;;  %v1762_v20 = vadd.f32 %v1284_v17, %v1067_v57 }
 0x218   : > { %v704_v19 = vpop.f32.mrf.mxu1 }
 0x219   : > { %1151 = vst [vmem:[%s1734_s11 + $0x20] sm:$0xff] %v1131_v18   ;;  %v1764_v21 = vadd.f32 %v1067_v57, %v704_v19 }
 0x21a   : > { %v1287_v22 = vpop.f32.mrf.mxu1 }
 0x21b   : > { %v1136_v23 = vpack.c.bf16 %v1762_v20, %v1764_v21  ;;  %v1769_v25 = vadd.f32 %v1287_v22, %v1067_v57 }
 0x21c   : > { %v714_v24 = vpop.f32.mrf.mxu1 }
 0x21d   : > { %1152 = vst [vmem:[%s1734_s11 + $0x28] sm:$0xff] %v1136_v23   ;;  %v1771_v26 = vadd.f32 %v1067_v57, %v714_v24 }
 0x21e   : > { %v1290_v27 = vpop.f32.mrf.mxu1 }
 0x21f   : > { %v1141_v28 = vpack.c.bf16 %v1769_v25, %v1771_v26  ;;  %v1776_v30 = vadd.f32 %v1290_v27, %v1067_v57 }
 0x220   : > { %v724_v29 = vpop.f32.mrf.mxu1 }
 0x221   : > { %1153 = vst [vmem:[%s1734_s11 + $0x30] sm:$0xff] %v1141_v28   ;;  %v1778_v31 = vadd.f32 %v1067_v57, %v724_v29  ;;  %822 = sbr.rel (%p1085_p10) target bundleno = 559 (0x22f), region = 56 }
 0x223   : > { %v1146_v32 = vpack.c.bf16 %v1776_v30, %v1778_v31 }
 0x225   : > { %1154 = vst [vmem:[%s1734_s11 + $0x38] sm:$0xff] %v1146_v32  }
 0x226   : > { %v1535_v33 = vmov 0.0  }
 0x227   : > { %824 = vst [vmem:[#allocation3 + $0x30] sm:$0xff] %v1535_v33  ;;  %825 = vst [vmem:[#allocation3] sm:$0xff] %v1535_v33 }
 0x228   : > { %826 = vst [vmem:[#allocation3 + $0x58] sm:$0xff] %v1535_v33  ;;  %827 = vst [vmem:[#allocation3 + $0x18] sm:$0xff] %v1535_v33 }
 0x229   : > { %828 = vst [vmem:[#allocation3 + $0x50] sm:$0xff] %v1535_v33  ;;  %829 = vst [vmem:[#allocation3 + $0x68] sm:$0xff] %v1535_v33 }
 0x22a   : > { %830 = vst [vmem:[#allocation3 + $0x8] sm:$0xff] %v1535_v33  ;;  %831 = vst [vmem:[#allocation3 + $0x48] sm:$0xff] %v1535_v33 }
 0x22b   : > { %832 = vst [vmem:[#allocation3 + $0x40] sm:$0xff] %v1535_v33  ;;  %833 = vst [vmem:[#allocation3 + $0x20] sm:$0xff] %v1535_v33 }
 0x22c   : > { %834 = vst [vmem:[#allocation3 + $0x10] sm:$0xff] %v1535_v33  ;;  %835 = vst [vmem:[#allocation3 + $0x38] sm:$0xff] %v1535_v33 }
 0x22d   : > { %836 = vst [vmem:[#allocation3 + $0x60] sm:$0xff] %v1535_v33  ;;  %837 = vst [vmem:[#allocation3 + $0x70] sm:$0xff] %v1535_v33 }
 0x22e   : > { %838 = vst [vmem:[#allocation3 + $0x78] sm:$0xff] %v1535_v33  ;;  %839 = vst [vmem:[#allocation3 + $0x28] sm:$0xff] %v1535_v33 }
 0x22f PF: > { %v841_v34 = vld [vmem:[#allocation3 + $0x30] sm:$0xff]  ;;  %v857_v35 = vstv %s1720_s26  ;;  %v842_v36 = vld [vmem:[#allocation3] sm:$0xff]  ;;  %v843_v37 = vld [vmem:[#allocation3 + $0x58] sm:$0xff] }
 0x230   : > { %v858_v38 = vmul.f32 %v857_v35, %v1730_v60  ;;  %v859_v39 = vmul.f32 %v857_v35, %v1728_v59  ;;  %v860_v40 = vmul.f32 %v857_v35, %v1739_v1  ;;  %v844_v41 = vld [vmem:[#allocation3 + $0x18] sm:$0xff]  ;;  %v861_v42 = vmul.f32 %v857_v35, %v1737_v0  ;;  %v845_v43 = vld [vmem:[#allocation3 + $0x50] sm:$0xff]  ;;  %v846_v44 = vld [vmem:[#allocation3 + $0x68] sm:$0xff] }
 0x231   : > { %v862_v45 = vmul.f32 %v857_v35, %v1746_v6  ;;  %v863_v46 = vmul.f32 %v857_v35, %v1744_v5  ;;  %v847_v47 = vld [vmem:[#allocation3 + $0x8] sm:$0xff]  ;;  %v864_v48 = vmul.f32 %v857_v35, %v685_v11  ;;  %v865_v50 = vmul.f32 %v857_v35, %v1751_v10 }
 0x232   : > { %v848_v49 = vld [vmem:[#allocation3 + $0x48] sm:$0xff]  ;;  %v874_v51 = vadd.f32 %v858_v38, %v841_v34  ;;  %v875_v52 = vadd.f32 %v859_v39, %v842_v36  ;;  %v876_v53 = vadd.f32 %v860_v40, %v843_v37  ;;  %v877_v54 = vadd.f32 %v861_v42, %v844_v41  ;;  %v849_v55 = vld [vmem:[#allocation3 + $0x40] sm:$0xff] }
 0x233   : > { %v850_v56 = vld [vmem:[#allocation3 + $0x20] sm:$0xff]  ;;  %v878_v57 = vadd.f32 %v862_v45, %v845_v43  ;;  %v879_v58 = vadd.f32 %v863_v46, %v846_v44  ;;  %v880_v59 = vadd.f32 %v864_v48, %v847_v47  ;;  %v881_v60 = vadd.f32 %v865_v50, %v848_v49  ;;  %v851_v61 = vld [vmem:[#allocation3 + $0x10] sm:$0xff]  ;;  %v852_v62 = vld [vmem:[#allocation3 + $0x38] sm:$0xff] }
 0x234   : > { %v853_v63 = vld [vmem:[#allocation3 + $0x60] sm:$0xff]  ;;  %890 = vst [vmem:[#allocation3 + $0x30] sm:$0xff] %v874_v51  ;;  %906 = vst [vmem:[%s1870_s4] sm:$0xff] %v874_v51  ;;  %v866_v0 = vmul.f32 %v857_v35, %v1757_v16  ;;  %v867_v1 = vmul.f32 %v857_v35, %v1755_v15  ;;  %v868_v2 = vmul.f32 %v857_v35, %v1764_v21  ;;  %v854_v4 = vld [vmem:[#allocation3 + $0x70] sm:$0xff] }
 0x235   : > { %891 = vst [vmem:[#allocation3] sm:$0xff] %v875_v52  ;;  %907 = vst [vmem:[%s1870_s4 + $0x8] sm:$0xff] %v875_v52  ;;  %v869_v3 = vmul.f32 %v857_v35, %v1762_v20  ;;  %v855_v5 = vld [vmem:[#allocation3 + $0x78] sm:$0xff]  ;;  %v856_v6 = vld [vmem:[#allocation3 + $0x28] sm:$0xff]  ;;  %v870_v7 = vmul.f32 %v857_v35, %v1771_v26  ;;  %v871_v8 = vmul.f32 %v857_v35, %v1769_v25 }
 0x236   : > { %892 = vst [vmem:[#allocation3 + $0x58] sm:$0xff] %v876_v53  ;;  %908 = vst [vmem:[%s1870_s4 + $0x10] sm:$0xff] %v876_v53  ;;  %v872_v9 = vmul.f32 %v857_v35, %v1778_v31  ;;  %v873_v10 = vmul.f32 %v857_v35, %v1776_v30  ;;  %v882_v11 = vadd.f32 %v866_v0, %v849_v55 }
 0x237   : > { %893 = vst [vmem:[#allocation3 + $0x18] sm:$0xff] %v877_v54  ;;  %909 = vst [vmem:[%s1870_s4 + $0x18] sm:$0xff] %v877_v54  ;;  %v883_v12 = vadd.f32 %v867_v1, %v850_v56  ;;  %v884_v13 = vadd.f32 %v868_v2, %v851_v61  ;;  %v885_v14 = vadd.f32 %v869_v3, %v852_v62 }
 0x238   : > { %894 = vst [vmem:[#allocation3 + $0x50] sm:$0xff] %v878_v57  ;;  %910 = vst [vmem:[%s1870_s4 + $0x20] sm:$0xff] %v878_v57  ;;  %v886_v15 = vadd.f32 %v870_v7, %v853_v63  ;;  %v887_v16 = vadd.f32 %v871_v8, %v854_v4  ;;  %v888_v17 = vadd.f32 %v872_v9, %v855_v5 }
 0x239   : > { %895 = vst [vmem:[#allocation3 + $0x68] sm:$0xff] %v879_v58  ;;  %911 = vst [vmem:[%s1870_s4 + $0x28] sm:$0xff] %v879_v58  ;;  %v889_v18 = vadd.f32 %v873_v10, %v856_v6 }
 0x23a   : > { %896 = vst [vmem:[#allocation3 + $0x8] sm:$0xff] %v880_v59  ;;  %912 = vst [vmem:[%s1870_s4 + $0x30] sm:$0xff] %v880_v59 }
 0x23b   : > { %897 = vst [vmem:[#allocation3 + $0x48] sm:$0xff] %v881_v60  ;;  %913 = vst [vmem:[%s1870_s4 + $0x38] sm:$0xff] %v881_v60 }
 0x23c   : > { %898 = vst [vmem:[#allocation3 + $0x40] sm:$0xff] %v882_v11  ;;  %914 = vst [vmem:[%s1870_s4 + $0x40] sm:$0xff] %v882_v11 }
 0x23d   : > { %899 = vst [vmem:[#allocation3 + $0x20] sm:$0xff] %v883_v12  ;;  %915 = vst [vmem:[%s1870_s4 + $0x48] sm:$0xff] %v883_v12 }
 0x23e   : > { %900 = vst [vmem:[#allocation3 + $0x10] sm:$0xff] %v884_v13  ;;  %916 = vst [vmem:[%s1870_s4 + $0x50] sm:$0xff] %v884_v13 }
 0x23f   : > { %901 = vst [vmem:[#allocation3 + $0x38] sm:$0xff] %v885_v14  ;;  %917 = vst [vmem:[%s1870_s4 + $0x58] sm:$0xff] %v885_v14 }
 0x240   : > { %902 = vst [vmem:[#allocation3 + $0x60] sm:$0xff] %v886_v15  ;;  %918 = vst [vmem:[%s1870_s4 + $0x60] sm:$0xff] %v886_v15 }
 0x241   : > { %903 = vst [vmem:[#allocation3 + $0x70] sm:$0xff] %v887_v16  ;;  %919 = vst [vmem:[%s1870_s4 + $0x68] sm:$0xff] %v887_v16 }
 0x242   : > { %904 = vst [vmem:[#allocation3 + $0x78] sm:$0xff] %v888_v17  ;;  %920 = vst [vmem:[%s1870_s4 + $0x70] sm:$0xff] %v888_v17 }
 0x243   : > { %905 = vst [vmem:[#allocation3 + $0x28] sm:$0xff] %v889_v18  ;;  %921 = vst [vmem:[%s1870_s4 + $0x78] sm:$0xff] %v889_v18 }
 0x244 PF: > { %s16_s20 = sadd.s32 1, %s1526_s20   ;;  %s1878_s15 = smov %s1510_s16 }
 0x245   : > { %p13_p9 = scmp.ge.s32.totalorder %s16_s20, 4   ;;  %s1879_s16 = smov %s1514_s17 }
 0x246   : > { %s1880_s17 = smov %s1656_s30  ;;  %s1881_s18 = smov %s1522_s19 }
 0x247   : > { %s1882_s19 = smov %s1884_s13  ;;  %15 = sbr.rel (!%p13_p9) target bundleno = 4 (0x4), region = 99 }
 0x24c   :  { %944 = vsyncpa [#allocation5], 1 }
 0x24d   :  { %946 = vsyncpa [#allocation5 + $0x1], 1 }
 0x24e   :  { %947 = vsyncpa [#allocation7], 1 }

// kernel: asfgnn_forward.3
= control target key start
LH: loop header
LB: loop body
LE: loop exit
PB: predicated region body
PF: predicated region fallthrough
CT: control target
= control target key end

     0   :  { %v326_v0 = vmov 0.0   ;;  %vm327_vm0 = vmmov 0   ;;  %s492_s1 = inlined_call_operand.vmem [shape: f32[128,128], index: 1, kind: input, shape index: {}]   ;;  %s493_s3 = inlined_call_operand.vmem [shape: f32[128,128], index: 3, kind: input, shape index: {}]   ;;  %s494_s0 = inlined_call_operand.vmem [shape: f32[8,128], index: 0, kind: input, shape index: {}]   ;;  %s495_s2 = inlined_call_operand.vmem [shape: f32[8,128], index: 2, kind: input, shape index: {}]   ;;  %s496_s4 = inlined_call_operand.vmem [shape: f32[8,128], index: 4, kind: output, shape index: {}]  }
   0x1   :  { %246 = vmatprep.subr.mxu0 %v326_v0  ;;  %281 = vmatprep.subr.mxu1 %v326_v0  ;;  %v33_v1 = vld [vmem:[%s492_s1 + $0x78] sm:$0xff]  ;;  %v32_v3 = vld [vmem:[%s492_s1 + $0x70] sm:$0xff]  ;;  %v31_v5 = vld [vmem:[%s492_s1 + $0x68] sm:$0xff] }
   0x2   :  { %v120_v2 = vld [vmem:[%s493_s3 + $0x78] sm:$0xff]  ;;  %247 = vmatpush3.xpose.msra.mxu0 %v33_v1  ;;  %v119_v4 = vld [vmem:[%s493_s3 + $0x70] sm:$0xff]  ;;  %278 = vmatprep.mubr.msk.f32.mxu0 %vm327_vm0, %v326_v0  ;;  %v118_v6 = vld [vmem:[%s493_s3 + $0x68] sm:$0xff] }
   0x3   :  { %282 = vmatpush3.xpose.msra.mxu1 %v120_v2  ;;  %248 = vmatprep.subr.mxu0 %v326_v0  ;;  %v30_v7 = vld [vmem:[%s492_s1 + $0x60] sm:$0xff]  ;;  %v29_v9 = vld [vmem:[%s492_s1 + $0x58] sm:$0xff]  ;;  %v28_v11 = vld [vmem:[%s492_s1 + $0x50] sm:$0xff] }
   0x4   :  { %283 = vmatprep.subr.mxu1 %v326_v0  ;;  %313 = vmatprep.mubr.msk.f32.mxu1 %vm327_vm0, %v326_v0  ;;  %v117_v8 = vld [vmem:[%s493_s3 + $0x60] sm:$0xff]  ;;  %v116_v10 = vld [vmem:[%s493_s3 + $0x58] sm:$0xff]  ;;  %v115_v12 = vld [vmem:[%s493_s3 + $0x50] sm:$0xff] }
   0x5   :  { %v27_v13 = vld [vmem:[%s492_s1 + $0x48] sm:$0xff]  ;;  %v26_v15 = vld [vmem:[%s492_s1 + $0x40] sm:$0xff]  ;;  %v25_v17 = vld [vmem:[%s492_s1 + $0x38] sm:$0xff] }
   0x6   :  { %249 = vmatpush3.xpose.msra.mxu0 %v32_v3  ;;  %v114_v14 = vld [vmem:[%s493_s3 + $0x48] sm:$0xff]  ;;  %v113_v16 = vld [vmem:[%s493_s3 + $0x40] sm:$0xff]  ;;  %v112_v18 = vld [vmem:[%s493_s3 + $0x38] sm:$0xff] }
   0x7   :  { %284 = vmatpush3.xpose.msra.mxu1 %v119_v4  ;;  %250 = vmatprep.subr.mxu0 %v326_v0  ;;  %v24_v19 = vld [vmem:[%s492_s1 + $0x30] sm:$0xff]  ;;  %v23_v21 = vld [vmem:[%s492_s1 + $0x28] sm:$0xff]  ;;  %v22_v23 = vld [vmem:[%s492_s1 + $0x20] sm:$0xff] }
   0x8   :  { %285 = vmatprep.subr.mxu1 %v326_v0  ;;  %v111_v20 = vld [vmem:[%s493_s3 + $0x30] sm:$0xff]  ;;  %v110_v22 = vld [vmem:[%s493_s3 + $0x28] sm:$0xff]  ;;  %v109_v24 = vld [vmem:[%s493_s3 + $0x20] sm:$0xff] }
   0x9   :  { %v21_v25 = vld [vmem:[%s492_s1 + $0x18] sm:$0xff]  ;;  %v20_v27 = vld [vmem:[%s492_s1 + $0x10] sm:$0xff]  ;;  %v19_v29 = vld [vmem:[%s492_s1 + $0x8] sm:$0xff] }
   0xa   :  { %251 = vmatpush3.xpose.msra.mxu0 %v31_v5  ;;  %v108_v26 = vld [vmem:[%s493_s3 + $0x18] sm:$0xff]  ;;  %v107_v28 = vld [vmem:[%s493_s3 + $0x10] sm:$0xff]  ;;  %v106_v30 = vld [vmem:[%s493_s3 + $0x8] sm:$0xff] }
   0xb   :  { %286 = vmatpush3.xpose.msra.mxu1 %v118_v6  ;;  %252 = vmatprep.subr.mxu0 %v326_v0  ;;  %v18_v31 = vld [vmem:[%s492_s1] sm:$0xff] }
   0xc   :  { %287 = vmatprep.subr.mxu1 %v326_v0  ;;  %v105_v32 = vld [vmem:[%s493_s3] sm:$0xff] }
   0xd   :  { %v17_v33 = vld [vmem:[%s494_s0] sm:$0xff] }
   0xe   :  { %253 = vmatpush3.xpose.msra.mxu0 %v30_v7  ;;  %v104_v34 = vld [vmem:[%s495_s2] sm:$0xff] }
   0xf   :  { %288 = vmatpush3.xpose.msra.mxu1 %v117_v8  ;;  %254 = vmatprep.subr.mxu0 %v326_v0 }
  0x10   :  { %289 = vmatprep.subr.mxu1 %v326_v0 }
  0x12   :  { %255 = vmatpush3.xpose.msra.mxu0 %v29_v9 }
  0x13   :  { %290 = vmatpush3.xpose.msra.mxu1 %v116_v10  ;;  %256 = vmatprep.subr.mxu0 %v326_v0 }
  0x14   :  { %291 = vmatprep.subr.mxu1 %v326_v0 }
  0x16   :  { %257 = vmatpush3.xpose.msra.mxu0 %v28_v11 }
  0x17   :  { %292 = vmatpush3.xpose.msra.mxu1 %v115_v12  ;;  %258 = vmatprep.subr.mxu0 %v326_v0 }
  0x18   :  { %293 = vmatprep.subr.mxu1 %v326_v0 }
  0x1a   :  { %259 = vmatpush3.xpose.msra.mxu0 %v27_v13 }
  0x1b   :  { %294 = vmatpush3.xpose.msra.mxu1 %v114_v14  ;;  %260 = vmatprep.subr.mxu0 %v326_v0 }
  0x1c   :  { %295 = vmatprep.subr.mxu1 %v326_v0 }
  0x1e   :  { %261 = vmatpush3.xpose.msra.mxu0 %v26_v15 }
  0x1f   :  { %296 = vmatpush3.xpose.msra.mxu1 %v113_v16  ;;  %262 = vmatprep.subr.mxu0 %v326_v0 }
  0x20   :  { %297 = vmatprep.subr.mxu1 %v326_v0 }
  0x22   :  { %263 = vmatpush3.xpose.msra.mxu0 %v25_v17 }
  0x23   :  { %298 = vmatpush3.xpose.msra.mxu1 %v112_v18  ;;  %264 = vmatprep.subr.mxu0 %v326_v0 }
  0x24   :  { %299 = vmatprep.subr.mxu1 %v326_v0 }
  0x26   :  { %265 = vmatpush3.xpose.msra.mxu0 %v24_v19 }
  0x27   :  { %300 = vmatpush3.xpose.msra.mxu1 %v111_v20  ;;  %266 = vmatprep.subr.mxu0 %v326_v0 }
  0x28   :  { %301 = vmatprep.subr.mxu1 %v326_v0 }
  0x2a   :  { %267 = vmatpush3.xpose.msra.mxu0 %v23_v21 }
  0x2b   :  { %302 = vmatpush3.xpose.msra.mxu1 %v110_v22  ;;  %268 = vmatprep.subr.mxu0 %v326_v0 }
  0x2c   :  { %303 = vmatprep.subr.mxu1 %v326_v0 }
  0x2e   :  { %269 = vmatpush3.xpose.msra.mxu0 %v22_v23 }
  0x2f   :  { %304 = vmatpush3.xpose.msra.mxu1 %v109_v24  ;;  %270 = vmatprep.subr.mxu0 %v326_v0 }
  0x30   :  { %305 = vmatprep.subr.mxu1 %v326_v0 }
  0x32   :  { %271 = vmatpush3.xpose.msra.mxu0 %v21_v25 }
  0x33   :  { %306 = vmatpush3.xpose.msra.mxu1 %v108_v26  ;;  %272 = vmatprep.subr.mxu0 %v326_v0 }
  0x34   :  { %307 = vmatprep.subr.mxu1 %v326_v0 }
  0x36   :  { %273 = vmatpush3.xpose.msra.mxu0 %v20_v27 }
  0x37   :  { %308 = vmatpush3.xpose.msra.mxu1 %v107_v28  ;;  %274 = vmatprep.subr.mxu0 %v326_v0 }
  0x38   :  { %309 = vmatprep.subr.mxu1 %v326_v0 }
  0x3a   :  { %275 = vmatpush3.xpose.msra.mxu0 %v19_v29 }
  0x3b   :  { %310 = vmatpush3.xpose.msra.mxu1 %v106_v30  ;;  %276 = vmatprep.subr.mxu0 %v326_v0 }
  0x3c   :  { %311 = vmatprep.subr.mxu1 %v326_v0 }
  0x3e   :  { %277 = vmatpush3.xpose.msra.mxu0 %v18_v31 }
  0x3f   :  { %312 = vmatpush3.xpose.msra.mxu1 %v105_v32 }
  0x41   :  { %279 = vmatmul.mubr.f32.vlgmr.msra.gmra.mxu0 %v17_v33 }
  0x42   :  { %314 = vmatmul.mubr.f32.vlgmr.msra.gmra.mxu1 %v104_v34 }
 0x101   :  { %v100_v35 = vpop.f32.mrf.mxu0 }
 0x102   :  { %v187_v36 = vpop.f32.mrf.mxu1  ;;  %v210_v37 = vmul.f32 -1.442695, %v100_v35 }
 0x103   :  { %v211_v38 = vmul.f32 -1.442695, %v187_v36  ;;  %v280_v39 = vpop.f32.mrf.mxu0 }
 0x104   :  { %v315_v40 = vpop.f32.mrf.mxu1  ;;  %318 = vpow2.f32 %v210_v37 }
 0x105   :  { %320 = vpow2.f32 %v211_v38 }
 0x111   :  { %v319_v41 = vpop.eup %318 }
 0x112   :  { %v321_v42 = vpop.eup %320  ;;  %v194_v43 = vadd.f32 1.0, %v319_v41 }
 0x113   :  { %v200_v44 = vadd.f32 1.0, %v321_v42 }
 0x114   :  { %322 = vrcp.f32 %v194_v43 }
 0x115   :  { %324 = vrcp.f32 %v200_v44 }
 0x121   :  { %v323_v45 = vpop.eup %322 }
 0x122   :  { %v325_v46 = vpop.eup %324 }
 0x123   :  { %v203_v47 = vmul.f32 0.5, %v325_v46 }
 0x125   :  { %v204_v48 = vadd.f32 %v323_v45, %v203_v47 }
 0x127   :  { %205 = vst [vmem:[%s496_s4] sm:$0xff] %v204_v48 }

</bundles_post_ra>
